<compile_context>
chip_gen: v6e
topology: v6e:2x2x1
jax: 0.10.0
libtpu: 0.0.40
codegen_flags: <defaults>
</compile_context>

<pallas_src>
import functools

import jax
import jax.numpy as jnp
from jax import lax
from jax.experimental import pallas as pl
from jax.experimental.pallas import tpu as pltpu

EPS = 1e-5      # PyTorch BatchNorm default eps
SUBLANE = 8     # TPU sublane width (row padding for matmul tap alignment)


def _round_up(x, m):
    return (x + m - 1) // m * m


def _full_spec(shape):
    # whole-array block (block_shape == array shape satisfies TPU tiling rules)
    return pl.BlockSpec(shape, lambda i: (0,) * len(shape))


# ----------------------------- Pallas kernels ------------------------------

def _conv1_kernel(p_ref, w_ref, s_ref, o_ref):
    """Conv1 block: one MXU matmul with the 4 pool taps packed into output
    column groups, then max over taps (two aligned lane-slice maxima),
    per-channel BN shift and ReLU.

    p_ref: (Gp, win*win*Ci) pool-fused patches (rows padded to multiple of 8)
    w_ref: (win*win*Ci, 4*Co) block weight (BN scale folded in)
    s_ref: (1, Co) shift; o_ref: (G, Co)
    """
    co = s_ref.shape[1]
    y = jnp.dot(p_ref[...], w_ref[...], preferred_element_type=jnp.float32)
    y = jnp.maximum(y[:, :2 * co], y[:, 2 * co:])          # max over tap row di
    y = jnp.maximum(y[:, :co], y[:, co:])                  # max over tap col dj
    y = jnp.maximum(y + s_ref[...], 0.0)                   # BN shift + ReLU
    o_ref[...] = y[:o_ref.shape[0]]                        # drop padded rows


def _tail_kernel(*refs, n_batch, hw2, k3, n_lin):
    """conv2 block + conv3 block + full MLP tail, all intermediates on-chip.

    refs = (p2, w2, s2, w3, s3, w_l0, s_l0, ..., w_out, b_out, o)
      p2: (Gp2, win2*win2*C1) pool-fused patches of conv1's pooled output,
          rows ordered (n, h, w) over hw2 x hw2 (padded to a multiple of 8)
      w2: (win2*win2*C1, 4*C2) block weight (taps in column groups)
      w3: (k3*k3*C2, C3) conv3 weight, rows ordered (i, j, ci)
    """
    p2_ref, w2_ref, s2_ref, w3_ref, s3_ref = refs[:5]
    lin_refs = refs[5:5 + 2 * n_lin]
    wo_ref, bo_ref = refs[5 + 2 * n_lin], refs[6 + 2 * n_lin]
    o_ref = refs[-1]

    # ---- conv2: one matmul over all 4 pool taps (column groups) ----
    c2 = s2_ref.shape[1]
    y = jnp.dot(p2_ref[...], w2_ref[...], preferred_element_type=jnp.float32)
    y = jnp.maximum(y[:, :2 * c2], y[:, 2 * c2:])          # max over di
    y = jnp.maximum(y[:, :c2], y[:, c2:])                  # max over dj
    y2 = jnp.maximum(y + s2_ref[...], 0.0)                 # (rows, C2), rows (n,h,w)

    # ---- conv3 + 2x2 max-pool (pooled output is 1x1 spatial) ----
    # 9 accumulated matmuls; lhs rows ordered (n, di, dj), built from
    # contiguous 2-row slices of the VMEM-resident conv2 activation.
    acc = None
    for i in range(k3):
        for j in range(k3):
            rows = []
            for n in range(n_batch):
                for di in range(2):
                    b = n * hw2 * hw2 + (di + i) * hw2 + j
                    rows.append(y2[b:b + 2, :])            # dj = 0, 1
            blk = jnp.concatenate(rows, axis=0)            # (4*n_batch, C2)
            p = i * k3 + j
            contrib = jnp.dot(blk, w3_ref[p * c2:(p + 1) * c2, :],
                              preferred_element_type=jnp.float32)
            acc = contrib if acc is None else acc + contrib

    hs = []
    for n in range(n_batch):                               # max over the 4 taps
        m = jnp.maximum(acc[4 * n:4 * n + 2], acc[4 * n + 2:4 * n + 4])
        hs.append(jnp.maximum(m[0:1], m[1:2]))
    h = jnp.concatenate(hs, axis=0)                        # (n_batch, C3) = flatten
    h = jnp.maximum(h + s3_ref[...], 0.0)

    # ---- MLP tail: (dense + BN shift + ReLU) x n_lin, then output layer ----
    for li in range(n_lin):
        w_ref, s_ref = lin_refs[2 * li], lin_refs[2 * li + 1]
        h = jnp.maximum(
            jnp.dot(h, w_ref[...], preferred_element_type=jnp.float32) + s_ref[...],
            0.0)
    o_ref[...] = (jnp.dot(h, wo_ref[...], preferred_element_type=jnp.float32)
                  + bo_ref[...])


# --------------------------- pallas_call wrappers ---------------------------

def conv1_pallas(p1, w1, s1, g_valid):
    co = s1.shape[1]
    return pl.pallas_call(
        _conv1_kernel,
        out_shape=jax.ShapeDtypeStruct((g_valid, co), jnp.float32),
        grid=(1,),
        in_specs=[_full_spec(p1.shape), _full_spec(w1.shape), _full_spec(s1.shape)],
        out_specs=_full_spec((g_valid, co)),
        compiler_params=pltpu.CompilerParams(dimension_semantics=("arbitrary",)),
    )(p1, w1, s1)


def tail_pallas(p2, tail_args, *, n_batch, hw2, k3, n_lin, out_size):
    args = [p2] + list(tail_args)
    in_specs = [_full_spec(a.shape) for a in args]
    kern = functools.partial(_tail_kernel, n_batch=n_batch, hw2=hw2, k3=k3,
                             n_lin=n_lin)
    return pl.pallas_call(
        kern,
        out_shape=jax.ShapeDtypeStruct((n_batch, out_size), jnp.float32),
        grid=(1,),
        in_specs=in_specs,
        out_specs=_full_spec((n_batch, out_size)),
        compiler_params=pltpu.CompilerParams(dimension_semantics=("arbitrary",)),
    )(*args)


# ------------------------------- glue (JAX) ---------------------------------

def _pool_window_patches(x, k):
    """x: (N,H,W,C) -> pool-fused im2col of (k+1)x(k+1) windows at stride 2.

    One window per 2x2-pooled output position; the 4 pool taps' conv patches
    are sub-windows of it (selected by the block weight).  Returns
    (N*hp*wp, (k+1)^2*C) with feature order (wi, wj, c), plus (hp, wp).
    Odd conv-output rows/cols are truncated exactly like nn.MaxPool2d(2, 2).
    """
    N, H, W, C = x.shape
    hp, wp = (H - k + 1) // 2, (W - k + 1) // 2
    win = k + 1
    cols = []
    for wi in range(win):
        for wj in range(win):
            cols.append(x[:, wi:wi + 2 * hp - 1:2, wj:wj + 2 * wp - 1:2, :])
    p = jnp.stack(cols, axis=3)                      # (N, hp, wp, win*win, C)
    return p.reshape(N * hp * wp, win * win * C), (hp, wp)


def bigger_lenet_forward(fused, x_nchw):
    x = jnp.transpose(x_nchw.astype(jnp.float32), (0, 2, 3, 1))   # NCHW -> NHWC
    n = x.shape[0]

    # --- conv block 1 (pallas call A) ---
    p1, (hp1, wp1) = _pool_window_patches(x, fused["k1"])
    g1 = p1.shape[0]
    p1 = jnp.pad(p1, ((0, _round_up(g1, SUBLANE) - g1), (0, 0)))
    y1 = conv1_pallas(p1, fused["w1"], fused["s1"], g1)           # (g1, C1)
    x1 = y1.reshape(n, hp1, wp1, -1)

    # --- conv2 + conv3 + MLP, fused (pallas call B) ---
    p2, (hp2, wp2) = _pool_window_patches(x1, fused["k2"])
    assert hp2 == wp2 and (hp2 - fused["k3"] + 1) // 2 == 1, \
        "tail kernel assumes conv3's pooled output is 1x1 (default BiggerLeNet)"
    g2 = p2.shape[0]
    p2 = jnp.pad(p2, ((0, _round_up(g2, SUBLANE) - g2), (0, 0)))
    return tail_pallas(p2, fused["tail"], n_batch=n, hw2=hp2, k3=fused["k3"],
                       n_lin=fused["n_lin"], out_size=fused["out_size"])


# ---------------------- deterministic synthetic params ----------------------

def init_raw_params(key, conv_out, conv_ks, lin_out, in_size, out_size):
    conv_in = [1] + conv_out[:-1]
    raw = {"conv": [], "lin": [], "out": None}
    h, w = in_size
    for ci, co, k in zip(conv_in, conv_out, conv_ks):
        key, *ks = jax.random.split(key, 7)
        fan = ci * k * k
        raw["conv"].append(dict(
            w=jax.random.normal(ks[0], (k, k, ci, co), jnp.float32) / jnp.sqrt(fan),
            b=0.1 * jax.random.normal(ks[1], (co,), jnp.float32),
            gamma=1.0 + 0.1 * jax.random.normal(ks[2], (co,), jnp.float32),
            beta=0.1 * jax.random.normal(ks[3], (co,), jnp.float32),
            mean=0.1 * jax.random.normal(ks[4], (co,), jnp.float32),
            var=1.0 + 0.1 * jax.random.uniform(ks[5], (co,), jnp.float32),
            ks=(k, k)))
        h, w = (h - k + 1) // 2, (w - k + 1) // 2
    flat = h * w * conv_out[-1]
    lin_in = [flat] + lin_out[:-1]
    for fi, fo in zip(lin_in, lin_out):
        key, *ks = jax.random.split(key, 7)
        raw["lin"].append(dict(
            w=jax.random.normal(ks[0], (fi, fo), jnp.float32) / jnp.sqrt(fi),
            b=0.1 * jax.random.normal(ks[1], (fo,), jnp.float32),
            gamma=1.0 + 0.1 * jax.random.normal(ks[2], (fo,), jnp.float32),
            beta=0.1 * jax.random.normal(ks[3], (fo,), jnp.float32),
            mean=0.1 * jax.random.normal(ks[4], (fo,), jnp.float32),
            var=1.0 + 0.1 * jax.random.uniform(ks[5], (fo,), jnp.float32)))
    key, k1, k2 = jax.random.split(key, 3)
    raw["out"] = dict(
        w=jax.random.normal(k1, (lin_out[-1], out_size), jnp.float32) / jnp.sqrt(lin_out[-1]),
        b=0.1 * jax.random.normal(k2, (out_size,), jnp.float32))
    return raw


def _fold_bn_conv(p):
    scale = p["gamma"] / jnp.sqrt(p["var"] + EPS)
    shift = (p["b"] - p["mean"]) * scale + p["beta"]
    return p["w"] * scale[None, None, None, :], shift


def _pool_fused_conv_weight(wf, k):
    """(k,k,Ci,Co) BN-folded conv weight -> ((k+1)^2*Ci, 4*Co) block weight.

    Column group t = di*2 + dj holds the conv kernel embedded at window offset
    (di, dj) of the (k+1)x(k+1) pool-fused patch (zeros elsewhere); rows are
    ordered (wi, wj, ci) to match _pool_window_patches.
    """
    win = k + 1
    ci, co = wf.shape[2], wf.shape[3]
    blocks = []
    for di in range(2):
        for dj in range(2):
            blocks.append(jnp.pad(wf, ((di, win - k - di), (dj, win - k - dj),
                                       (0, 0), (0, 0))))
    return jnp.stack(blocks, axis=3).reshape(win * win * ci, 4 * co)


def fuse_for_kernels(raw):
    """Fold eval-mode BN into weights/shifts and build the kernel operands."""
    c1, c2, c3 = raw["conv"]
    wf1, s1 = _fold_bn_conv(c1)
    wf2, s2 = _fold_bn_conv(c2)
    wf3, s3 = _fold_bn_conv(c3)
    k1, k2, k3 = c1["ks"][0], c2["ks"][0], c3["ks"][0]

    tail = [_pool_fused_conv_weight(wf2, k2), s2.reshape(1, -1),
            wf3.reshape(k3 * k3 * wf3.shape[2], wf3.shape[3]), s3.reshape(1, -1)]
    for p in raw["lin"]:
        scale = p["gamma"] / jnp.sqrt(p["var"] + EPS)
        shift = (p["b"] - p["mean"]) * scale + p["beta"]
        tail += [p["w"] * scale[None, :], shift.reshape(1, -1)]
    tail += [raw["out"]["w"], raw["out"]["b"].reshape(1, -1)]

    return dict(w1=_pool_fused_conv_weight(wf1, k1), s1=s1.reshape(1, -1),
                k1=k1, k2=k2, k3=k3, tail=tail, n_lin=len(raw["lin"]),
                out_size=raw["out"]["w"].shape[1])


# ------------------------- pure-JAX reference check -------------------------

def reference_forward(raw, x_nchw):
    t = x_nchw.astype(jnp.float32)
    for p in raw["conv"]:
        t = lax.conv_general_dilated(t, p["w"], (1, 1), "VALID",
                                     dimension_numbers=("NCHW", "HWIO", "NCHW"))
        t = t + p["b"][None, :, None, None]
        t = (t - p["mean"][None, :, None, None]) / jnp.sqrt(p["var"][None, :, None, None] + EPS)
        t = t * p["gamma"][None, :, None, None] + p["beta"][None, :, None, None]
        t = jnp.maximum(t, 0.0)
        t = lax.reduce_window(t, -jnp.inf, lax.max, (1, 1, 2, 2), (1, 1, 2, 2), "VALID")
    t = t.reshape(t.shape[0], -1)
    for p in raw["lin"]:
        t = t @ p["w"] + p["b"]
        t = (t - p["mean"]) / jnp.sqrt(p["var"] + EPS) * p["gamma"] + p["beta"]
        t = jnp.maximum(t, 0.0)
    return t @ raw["out"]["w"] + raw["out"]["b"]


# ----------------------------------- main ------------------------------------

if __name__ == "__main__":
    # BiggerLeNet defaults: conv_out=[32,64,128], ks=[3,3,3], lin_out=[400,120,60]
    conv_out, conv_ks = [32, 64, 128], [3, 3, 3]
    lin_out, in_size, out_size = [400, 120, 60], (28, 28), 10

    key = jax.random.PRNGKey(0)
    kp, kx = jax.random.split(key)
    raw = init_raw_params(kp, conv_out, conv_ks, lin_out, in_size, out_size)
    fused = fuse_for_kernels(raw)

    x = jax.random.normal(kx, (2, 1, in_size[0], in_size[1]), jnp.float32)

    out = bigger_lenet_forward(fused, x)
    out = jax.block_until_ready(out)

    ref = reference_forward(raw, x)
    assert out.shape == (2, out_size), out.shape
    assert jnp.allclose(out, ref, atol=2e-3, rtol=2e-3), (out, ref)
    print("KERNEL_OK")
</pallas_src>

<mosaic_0001>
module attributes {stable_mosaic.version = 11 : i64} {
  func.func @_conv1_kernel(%arg0: i32, %arg1: memref<344x16xf32, #tpu.memory_space<vmem>>, %arg2: memref<16x128xf32, #tpu.memory_space<vmem>>, %arg3: memref<1x32xf32, #tpu.memory_space<vmem>>, %arg4: memref<338x32xf32, #tpu.memory_space<vmem>>) attributes {dimension_semantics = [#tpu.dimension_semantics<arbitrary>], iteration_bounds = array<i64: 1>, scalar_prefetch = 0 : i64, scratch_operands = 0 : i64, tpu.core_type = #tpu.core_type<tc>, window_params = [{pipeline_mode = #tpu.pipeline_mode<synchronous>, transform_indices = @transform_0, window_bounds = array<i64: 344, 16>}, {pipeline_mode = #tpu.pipeline_mode<synchronous>, transform_indices = @transform_1, window_bounds = array<i64: 16, 128>}, {pipeline_mode = #tpu.pipeline_mode<synchronous>, transform_indices = @transform_2, window_bounds = array<i64: 1, 32>}, {pipeline_mode = #tpu.pipeline_mode<synchronous>, transform_indices = @transform_3, window_bounds = array<i64: 338, 32>}]} {
    %c0 = arith.constant 0 : index
    %c0_0 = arith.constant 0 : index
    %0 = vector.load %arg1[%c0, %c0_0] : memref<344x16xf32, #tpu.memory_space<vmem>>, vector<344x16xf32>
    %c0_1 = arith.constant 0 : index
    %c0_2 = arith.constant 0 : index
    %1 = vector.load %arg2[%c0_1, %c0_2] : memref<16x128xf32, #tpu.memory_space<vmem>>, vector<16x128xf32>
    %cst = arith.constant dense<0.000000e+00> : vector<344x128xf32>
    %2 = tpu.matmul %0, %1, %cst {dimension_numbers = #tpu.dot_dimension_numbers<[1], [0], [0], [1], [0, 0, 1, 1], [], []>} : vector<344x16xf32>, vector<16x128xf32>, vector<344x128xf32> -> vector<344x128xf32>
    %3 = vector.extract_strided_slice %2 {offsets = [0, 0], sizes = [344, 64], strides = [1, 1]} : vector<344x128xf32> to vector<344x64xf32>
    %4 = vector.extract_strided_slice %2 {offsets = [0, 64], sizes = [344, 64], strides = [1, 1]} : vector<344x128xf32> to vector<344x64xf32>
    %5 = arith.maximumf %3, %4 : vector<344x64xf32>
    %6 = vector.extract_strided_slice %5 {offsets = [0, 0], sizes = [344, 32], strides = [1, 1]} : vector<344x64xf32> to vector<344x32xf32>
    %7 = vector.extract_strided_slice %5 {offsets = [0, 32], sizes = [344, 32], strides = [1, 1]} : vector<344x64xf32> to vector<344x32xf32>
    %8 = arith.maximumf %6, %7 : vector<344x32xf32>
    %c0_3 = arith.constant 0 : index
    %c0_4 = arith.constant 0 : index
    %9 = vector.load %arg3[%c0_3, %c0_4] : memref<1x32xf32, #tpu.memory_space<vmem>>, vector<1x32xf32>
    %10 = vector.broadcast %9 : vector<1x32xf32> to vector<344x32xf32>
    %11 = arith.addf %8, %10 : vector<344x32xf32>
    %cst_5 = arith.constant 0.000000e+00 : f32
    %12 = vector.broadcast %cst_5 : f32 to vector<344x32xf32>
    %13 = arith.maximumf %11, %12 : vector<344x32xf32>
    %14 = vector.extract_strided_slice %13 {offsets = [0, 0], sizes = [338, 32], strides = [1, 1]} : vector<344x32xf32> to vector<338x32xf32>
    %c0_6 = arith.constant 0 : index
    %c0_7 = arith.constant 0 : index
    %15 = vector.load %arg4[%c0_6, %c0_7] : memref<338x32xf32, #tpu.memory_space<vmem>>, vector<338x32xf32>
    tpu.vector_store %arg4[%c0_6, %c0_7], %14 {strides = array<i32>} : memref<338x32xf32, #tpu.memory_space<vmem>>, vector<338x32xf32>,
    return
  }
  func.func @transform_0(%arg0: i32) -> (i32, i32) {
    %c0_i32 = arith.constant 0 : i32
    %c0_i32_0 = arith.constant 0 : i32
    %c0_i32_1 = arith.constant 0 : i32
    return %c0_i32, %c0_i32_0 : i32, i32
  }
  func.func @transform_1(%arg0: i32) -> (i32, i32) {
    %c0_i32 = arith.constant 0 : i32
    %c0_i32_0 = arith.constant 0 : i32
    %c0_i32_1 = arith.constant 0 : i32
    return %c0_i32, %c0_i32_0 : i32, i32
  }
  func.func @transform_2(%arg0: i32) -> (i32, i32) {
    %c0_i32 = arith.constant 0 : i32
    %c0_i32_0 = arith.constant 0 : i32
    %c0_i32_1 = arith.constant 0 : i32
    return %c0_i32, %c0_i32_0 : i32, i32
  }
  func.func @transform_3(%arg0: i32) -> (i32, i32) {
    %c0_i32 = arith.constant 0 : i32
    %c0_i32_0 = arith.constant 0 : i32
    %c0_i32_1 = arith.constant 0 : i32
    return %c0_i32, %c0_i32_0 : i32, i32
  }
}

</mosaic_0001>

<bundles_post_ra>
// kernel: tpu_custom_call.1
= control target key start
LH: loop header
LB: loop body
LE: loop exit
PB: predicated region body
PF: predicated region fallthrough
CT: control target
= control target key end

     0   :  { %v1271_v0 = vmov 0.0   ;;  %vm59_vm0 = vcmask 130048   ;;  %vm1272_vm1 = vmmov 0   ;;  %s1273_s18 = smov 64   ;;  %vm992_vm2 = vcmask 261120   ;;  %s2212_s1 = inlined_call_operand.vmem [shape: f32[16,128], index: 1, kind: input, shape index: {}]   ;;  %s2213_s0 = inlined_call_operand.vmem [shape: f32[344,16], index: 0, kind: input, shape index: {}]   ;;  %s2214_s2 = inlined_call_operand.vmem [shape: f32[1,32], index: 2, kind: input, shape index: {}]   ;;  %s2215_s3 = inlined_call_operand.vmem [shape: f32[338,32], index: 3, kind: output, shape index: {}]  }
   0x1   :  { %1130 = vmatprep.subr.mxu0 %v1271_v0  ;;  %1263 = vmatprep.subr.mxu1 %v1271_v0  ;;  %v58_v1 = vld [vmem:[%s2212_s1 + $0x8] sm:$0xff]  ;;  %v57_v2 = vld [vmem:[%s2212_s1] sm:$0xff]  ;;  %v36_v4 = vld [vmem:[%s2213_s0 + $0xb0] sm:$0xff]  ;;  %vm1035_vm3 = vcmask 254976  }
   0x2   :  { %1131 = vmatpush3.msra.mxu0 %v58_v1  ;;  %1265 = vmatpush3.msra.mxu1 %v58_v1  ;;  %v14_v3 = vld [vmem:[%s2213_s0] sm:$0xff]  ;;  %v15_v5 = vld [vmem:[%s2213_s0 + $0x8] sm:$0xff]  ;;  %v37_v6 = vld [vmem:[%s2213_s0 + $0xb8] sm:$0xff] }
   0x3   :  { %1132 = vmatprep.subr.mxu0 %v1271_v0  ;;  %1264 = vmatprep.subr.mxu1 %v1271_v0  ;;  %v16_v7 = vld [vmem:[%s2213_s0 + $0x10] sm:$0xff]  ;;  %v38_v8 = vld [vmem:[%s2213_s0 + $0xc0] sm:$0xff]  ;;  %v17_v9 = vld [vmem:[%s2213_s0 + $0x18] sm:$0xff] }
   0x4   :  { %1133 = vmatpush3.msra.mxu0 %v57_v2  ;;  %1266 = vmatpush3.msra.mxu1 %v57_v2  ;;  %v39_v10 = vld [vmem:[%s2213_s0 + $0xc8] sm:$0xff]  ;;  %v18_v11 = vld [vmem:[%s2213_s0 + $0x20] sm:$0xff]  ;;  %v40_v12 = vld [vmem:[%s2213_s0 + $0xd0] sm:$0xff] }
   0x5   :  { %1134 = vmatprep.mubr.msk.f32.mxu0 %vm1272_vm1, %v1271_v0  ;;  %1200 = vmatprep.mubr.msk.f32.mxu1 %vm1272_vm1, %v1271_v0  ;;  %v19_v13 = vld [vmem:[%s2213_s0 + $0x28] sm:$0xff]  ;;  %v41_v14 = vld [vmem:[%s2213_s0 + $0xd8] sm:$0xff]  ;;  %v20_v15 = vld [vmem:[%s2213_s0 + $0x30] sm:$0xff] }
   0x6   :  { %1135 = vmatmul.mubr.msk.f32.vlgmr.msra.gmra.mxu0 %vm59_vm0, %v14_v3  ;;  %1201 = vmatmul.mubr.msk.f32.vlgmr.msra.gmra.mxu1 %vm59_vm0, %v36_v4  ;;  %v42_v16 = vld [vmem:[%s2213_s0 + $0xe0] sm:$0xff]  ;;  %v21_v17 = vld [vmem:[%s2213_s0 + $0x38] sm:$0xff]  ;;  %v43_v18 = vld [vmem:[%s2213_s0 + $0xe8] sm:$0xff] }
   0x7   :  { %1137 = vmatprep.mubr.msk.f32.mxu0 %vm1272_vm1, %v1271_v0  ;;  %1203 = vmatprep.mubr.msk.f32.mxu1 %vm1272_vm1, %v1271_v0  ;;  %v22_v19 = vld [vmem:[%s2213_s0 + $0x40] sm:$0xff]  ;;  %v44_v20 = vld [vmem:[%s2213_s0 + $0xf0] sm:$0xff]  ;;  %v23_v21 = vld [vmem:[%s2213_s0 + $0x48] sm:$0xff] }
   0x8   :  { %v45_v22 = vld [vmem:[%s2213_s0 + $0xf8] sm:$0xff]  ;;  %v24_v23 = vld [vmem:[%s2213_s0 + $0x50] sm:$0xff]  ;;  %v46_v24 = vld [vmem:[%s2213_s0 + $0x100] sm:$0xff] }
   0x9   :  { %v25_v25 = vld [vmem:[%s2213_s0 + $0x58] sm:$0xff]  ;;  %v47_v26 = vld [vmem:[%s2213_s0 + $0x108] sm:$0xff]  ;;  %v26_v27 = vld [vmem:[%s2213_s0 + $0x60] sm:$0xff] }
   0xa   :  { %1138 = vmatmul.mubr.msk.f32.gmra.mxu0 %vm59_vm0, %v15_v5  ;;  %1204 = vmatmul.mubr.msk.f32.gmra.mxu1 %vm59_vm0, %v37_v6  ;;  %v48_v28 = vld [vmem:[%s2213_s0 + $0x110] sm:$0xff]  ;;  %v27_v29 = vld [vmem:[%s2213_s0 + $0x68] sm:$0xff]  ;;  %v49_v30 = vld [vmem:[%s2213_s0 + $0x118] sm:$0xff] }
   0xb   :  { %1140 = vmatprep.mubr.msk.f32.mxu0 %vm1272_vm1, %v1271_v0  ;;  %1206 = vmatprep.mubr.msk.f32.mxu1 %vm1272_vm1, %v1271_v0  ;;  %v28_v31 = vld [vmem:[%s2213_s0 + $0x70] sm:$0xff]  ;;  %v50_v32 = vld [vmem:[%s2213_s0 + $0x120] sm:$0xff]  ;;  %v29_v33 = vld [vmem:[%s2213_s0 + $0x78] sm:$0xff] }
   0xc   :  { %v51_v34 = vld [vmem:[%s2213_s0 + $0x128] sm:$0xff]  ;;  %v30_v35 = vld [vmem:[%s2213_s0 + $0x80] sm:$0xff]  ;;  %v52_v36 = vld [vmem:[%s2213_s0 + $0x130] sm:$0xff] }
   0xd   :  { %v31_v37 = vld [vmem:[%s2213_s0 + $0x88] sm:$0xff]  ;;  %v53_v38 = vld [vmem:[%s2213_s0 + $0x138] sm:$0xff]  ;;  %v32_v39 = vld [vmem:[%s2213_s0 + $0x90] sm:$0xff] }
   0xe   :  { %1141 = vmatmul.mubr.msk.f32.gmra.mxu0 %vm59_vm0, %v16_v7  ;;  %1207 = vmatmul.mubr.msk.f32.gmra.mxu1 %vm59_vm0, %v38_v8  ;;  %v54_v40 = vld [vmem:[%s2213_s0 + $0x140] sm:$0xff]  ;;  %v33_v41 = vld [vmem:[%s2213_s0 + $0x98] sm:$0xff]  ;;  %v55_v42 = vld [vmem:[%s2213_s0 + $0x148] sm:$0xff] }
   0xf   :  { %1143 = vmatprep.mubr.msk.f32.mxu0 %vm1272_vm1, %v1271_v0  ;;  %1209 = vmatprep.mubr.msk.f32.mxu1 %vm1272_vm1, %v1271_v0  ;;  %v34_v43 = vld [vmem:[%s2213_s0 + $0xa0] sm:$0xff]  ;;  %v56_v44 = vld [vmem:[%s2213_s0 + $0x150] sm:$0xff]  ;;  %v35_v45 = vld [vmem:[%s2213_s0 + $0xa8] sm:$0xff]  ;;  %s1274_s0 = smov 96  }
  0x12   :  { %1144 = vmatmul.mubr.msk.f32.gmra.mxu0 %vm59_vm0, %v17_v9  ;;  %1210 = vmatmul.mubr.msk.f32.gmra.mxu1 %vm59_vm0, %v39_v10 }
  0x13   :  { %1146 = vmatprep.mubr.msk.f32.mxu0 %vm1272_vm1, %v1271_v0  ;;  %1212 = vmatprep.mubr.msk.f32.mxu1 %vm1272_vm1, %v1271_v0 }
  0x16   :  { %1147 = vmatmul.mubr.msk.f32.gmra.mxu0 %vm59_vm0, %v18_v11  ;;  %1213 = vmatmul.mubr.msk.f32.gmra.mxu1 %vm59_vm0, %v40_v12 }
  0x17   :  { %1149 = vmatprep.mubr.msk.f32.mxu0 %vm1272_vm1, %v1271_v0  ;;  %1215 = vmatprep.mubr.msk.f32.mxu1 %vm1272_vm1, %v1271_v0 }
  0x1a   :  { %1150 = vmatmul.mubr.msk.f32.gmra.mxu0 %vm59_vm0, %v19_v13  ;;  %1216 = vmatmul.mubr.msk.f32.gmra.mxu1 %vm59_vm0, %v41_v14 }
  0x1b   :  { %1152 = vmatprep.mubr.msk.f32.mxu0 %vm1272_vm1, %v1271_v0  ;;  %1218 = vmatprep.mubr.msk.f32.mxu1 %vm1272_vm1, %v1271_v0 }
  0x1e   :  { %1153 = vmatmul.mubr.msk.f32.gmra.mxu0 %vm59_vm0, %v20_v15  ;;  %1219 = vmatmul.mubr.msk.f32.gmra.mxu1 %vm59_vm0, %v42_v16 }
  0x1f   :  { %1155 = vmatprep.mubr.msk.f32.mxu0 %vm1272_vm1, %v1271_v0  ;;  %1221 = vmatprep.mubr.msk.f32.mxu1 %vm1272_vm1, %v1271_v0 }
  0x22   :  { %1156 = vmatmul.mubr.msk.f32.gmra.mxu0 %vm59_vm0, %v21_v17  ;;  %1222 = vmatmul.mubr.msk.f32.gmra.mxu1 %vm59_vm0, %v43_v18 }
  0x23   :  { %1158 = vmatprep.mubr.msk.f32.mxu0 %vm1272_vm1, %v1271_v0  ;;  %1224 = vmatprep.mubr.msk.f32.mxu1 %vm1272_vm1, %v1271_v0 }
  0x26   :  { %1159 = vmatmul.mubr.msk.f32.gmra.mxu0 %vm59_vm0, %v22_v19  ;;  %1225 = vmatmul.mubr.msk.f32.gmra.mxu1 %vm59_vm0, %v44_v20 }
  0x27   :  { %1161 = vmatprep.mubr.msk.f32.mxu0 %vm1272_vm1, %v1271_v0  ;;  %1227 = vmatprep.mubr.msk.f32.mxu1 %vm1272_vm1, %v1271_v0 }
  0x2a   :  { %1162 = vmatmul.mubr.msk.f32.gmra.mxu0 %vm59_vm0, %v23_v21  ;;  %1228 = vmatmul.mubr.msk.f32.gmra.mxu1 %vm59_vm0, %v45_v22 }
  0x2b   :  { %1164 = vmatprep.mubr.msk.f32.mxu0 %vm1272_vm1, %v1271_v0  ;;  %1230 = vmatprep.mubr.msk.f32.mxu1 %vm1272_vm1, %v1271_v0 }
  0x2e   :  { %1165 = vmatmul.mubr.msk.f32.gmra.mxu0 %vm59_vm0, %v24_v23  ;;  %1231 = vmatmul.mubr.msk.f32.gmra.mxu1 %vm59_vm0, %v46_v24 }
  0x2f   :  { %1167 = vmatprep.mubr.msk.f32.mxu0 %vm1272_vm1, %v1271_v0  ;;  %1233 = vmatprep.mubr.msk.f32.mxu1 %vm1272_vm1, %v1271_v0 }
  0x32   :  { %1168 = vmatmul.mubr.msk.f32.gmra.mxu0 %vm59_vm0, %v25_v25  ;;  %1234 = vmatmul.mubr.msk.f32.gmra.mxu1 %vm59_vm0, %v47_v26 }
  0x33   :  { %1170 = vmatprep.mubr.msk.f32.mxu0 %vm1272_vm1, %v1271_v0  ;;  %1236 = vmatprep.mubr.msk.f32.mxu1 %vm1272_vm1, %v1271_v0 }
  0x36   :  { %1171 = vmatmul.mubr.msk.f32.gmra.mxu0 %vm59_vm0, %v26_v27  ;;  %1237 = vmatmul.mubr.msk.f32.gmra.mxu1 %vm59_vm0, %v48_v28 }
  0x37   :  { %1173 = vmatprep.mubr.msk.f32.mxu0 %vm1272_vm1, %v1271_v0  ;;  %1239 = vmatprep.mubr.msk.f32.mxu1 %vm1272_vm1, %v1271_v0 }
  0x3a   :  { %1174 = vmatmul.mubr.msk.f32.gmra.mxu0 %vm59_vm0, %v27_v29  ;;  %1240 = vmatmul.mubr.msk.f32.gmra.mxu1 %vm59_vm0, %v49_v30 }
  0x3b   :  { %1176 = vmatprep.mubr.msk.f32.mxu0 %vm1272_vm1, %v1271_v0  ;;  %1242 = vmatprep.mubr.msk.f32.mxu1 %vm1272_vm1, %v1271_v0 }
  0x3e   :  { %1177 = vmatmul.mubr.msk.f32.gmra.mxu0 %vm59_vm0, %v28_v31  ;;  %1243 = vmatmul.mubr.msk.f32.gmra.mxu1 %vm59_vm0, %v50_v32 }
  0x3f   :  { %1179 = vmatprep.mubr.msk.f32.mxu0 %vm1272_vm1, %v1271_v0  ;;  %1245 = vmatprep.mubr.msk.f32.mxu1 %vm1272_vm1, %v1271_v0 }
  0x42   :  { %1180 = vmatmul.mubr.msk.f32.gmra.mxu0 %vm59_vm0, %v29_v33  ;;  %1246 = vmatmul.mubr.msk.f32.gmra.mxu1 %vm59_vm0, %v51_v34 }
  0x43   :  { %1182 = vmatprep.mubr.msk.f32.mxu0 %vm1272_vm1, %v1271_v0  ;;  %1248 = vmatprep.mubr.msk.f32.mxu1 %vm1272_vm1, %v1271_v0 }
  0x46   :  { %1183 = vmatmul.mubr.msk.f32.gmra.mxu0 %vm59_vm0, %v30_v35  ;;  %1249 = vmatmul.mubr.msk.f32.gmra.mxu1 %vm59_vm0, %v52_v36 }
  0x47   :  { %1185 = vmatprep.mubr.msk.f32.mxu0 %vm1272_vm1, %v1271_v0  ;;  %1251 = vmatprep.mubr.msk.f32.mxu1 %vm1272_vm1, %v1271_v0 }
  0x4a   :  { %1186 = vmatmul.mubr.msk.f32.gmra.mxu0 %vm59_vm0, %v31_v37  ;;  %1252 = vmatmul.mubr.msk.f32.gmra.mxu1 %vm59_vm0, %v53_v38 }
  0x4b   :  { %1188 = vmatprep.mubr.msk.f32.mxu0 %vm1272_vm1, %v1271_v0  ;;  %1254 = vmatprep.mubr.msk.f32.mxu1 %vm1272_vm1, %v1271_v0 }
  0x4e   :  { %1189 = vmatmul.mubr.msk.f32.gmra.mxu0 %vm59_vm0, %v32_v39  ;;  %1255 = vmatmul.mubr.msk.f32.gmra.mxu1 %vm59_vm0, %v54_v40 }
  0x4f   :  { %1191 = vmatprep.mubr.msk.f32.mxu0 %vm1272_vm1, %v1271_v0  ;;  %1257 = vmatprep.mubr.msk.f32.mxu1 %vm1272_vm1, %v1271_v0 }
  0x52   :  { %1192 = vmatmul.mubr.msk.f32.gmra.mxu0 %vm59_vm0, %v33_v41  ;;  %1258 = vmatmul.mubr.msk.f32.gmra.mxu1 %vm59_vm0, %v55_v42 }
  0x53   :  { %1194 = vmatprep.mubr.msk.f32.mxu0 %vm1272_vm1, %v1271_v0  ;;  %1260 = vmatprep.mubr.msk.f32.mxu1 %vm1272_vm1, %v1271_v0 }
  0x56   :  { %1195 = vmatmul.mubr.msk.f32.gmra.mxu0 %vm59_vm0, %v34_v43  ;;  %1261 = vmatmul.mubr.msk.f32.gmra.mxu1 %vm59_vm0, %v56_v44 }
  0x57   :  { %1197 = vmatprep.mubr.msk.f32.mxu0 %vm1272_vm1, %v1271_v0 }
  0x5a   :  { %1198 = vmatmul.mubr.msk.f32.gmra.mxu0 %vm59_vm0, %v35_v45 }
  0xc6   :  { %v1563_v46 = vpop.f32.mrf.mxu0  ;;  %v1565_v47 = vpop.f32.mrf.mxu1 }
  0xc7   :  { %512 = vrot.lane.b32.xlu0 %v1563_v46, %s1273_s18 }
  0xc8   :  { %v1136_v48 = vpop.f32.mrf.mxu0  ;;  %v1202_v49 = vpop.f32.mrf.mxu1 }
  0xca   :  { %v1569_v50 = vpop.f32.mrf.mxu0  ;;  %v1571_v51 = vpop.f32.mrf.mxu1 }
  0xcb   :  { %558 = vrot.lane.b32.xlu1 %v1571_v51, %s1273_s18  ;;  %556 = vrot.lane.b32.xlu0 %v1565_v47, %s1273_s18 }
  0xcc   :  { %v1139_v52 = vpop.f32.mrf.mxu0  ;;  %v1205_v53 = vpop.f32.mrf.mxu1 }
  0xce   :  { %v1577_v54 = vpop.f32.mrf.mxu0  ;;  %v1579_v55 = vpop.f32.mrf.mxu1 }
  0xcf   :  { %514 = vrot.lane.b32.xlu0 %v1569_v50, %s1273_s18  ;;  %516 = vrot.lane.b32.xlu1 %v1577_v54, %s1273_s18 }
  0xd0   :  { %v1142_v56 = vpop.f32.mrf.mxu0  ;;  %v1208_v57 = vpop.f32.mrf.mxu1 }
  0xd2   :  { %v1585_v58 = vpop.f32.mrf.mxu0  ;;  %v1587_v59 = vpop.f32.mrf.mxu1 }
  0xd3   :  { %560 = vrot.lane.b32.xlu0 %v1579_v55, %s1273_s18  ;;  %518 = vrot.lane.b32.xlu1 %v1585_v58, %s1273_s18 }
  0xd4   :  { %v1145_v60 = vpop.f32.mrf.mxu0  ;;  %v1211_v61 = vpop.f32.mrf.mxu1 }
  0xd6   :  { %v1593_v62 = vpop.f32.mrf.mxu0  ;;  %v1595_v63 = vpop.f32.mrf.mxu1 }
  0xd7   :  { %562 = vrot.lane.b32.xlu1 %v1587_v59, %s1273_s18  ;;  %520 = vrot.lane.b32.xlu0 %v1593_v62, %s1273_s18 }
  0xd8   :  { %v1148_v0 = vpop.f32.mrf.mxu0  ;;  %v1214_v1 = vpop.f32.mrf.mxu1 }
  0xda   :  { %v1601_v2 = vpop.f32.mrf.mxu0  ;;  %v1603_v3 = vpop.f32.mrf.mxu1 }
  0xdb   :  { %564 = vrot.lane.b32.xlu0 %v1595_v63, %s1273_s18  ;;  %522 = vrot.lane.b32.xlu1 %v1601_v2, %s1273_s18 }
  0xdc   :  { %v1151_v4 = vpop.f32.mrf.mxu0  ;;  %v1217_v5 = vpop.f32.mrf.mxu1 }
  0xde   :  { %v1609_v6 = vpop.f32.mrf.mxu0  ;;  %v1611_v7 = vpop.f32.mrf.mxu1 }
  0xdf   :  { %566 = vrot.lane.b32.xlu1 %v1603_v3, %s1273_s18  ;;  %524 = vrot.lane.b32.xlu0 %v1609_v6, %s1273_s18 }
  0xe0   :  { %v1154_v8 = vpop.f32.mrf.mxu0  ;;  %v1220_v9 = vpop.f32.mrf.mxu1 }
  0xe2   :  { %v1617_v10 = vpop.f32.mrf.mxu0  ;;  %v1619_v11 = vpop.f32.mrf.mxu1 }
  0xe3   :  { %568 = vrot.lane.b32.xlu0 %v1611_v7, %s1273_s18  ;;  %526 = vrot.lane.b32.xlu1 %v1617_v10, %s1273_s18 }
  0xe4   :  { %v1157_v12 = vpop.f32.mrf.mxu0  ;;  %v1223_v13 = vpop.f32.mrf.mxu1 }
  0xe6   :  { %v1625_v14 = vpop.f32.mrf.mxu0  ;;  %v1627_v15 = vpop.f32.mrf.mxu1 }
  0xe7   :  { %570 = vrot.lane.b32.xlu1 %v1619_v11, %s1273_s18  ;;  %528 = vrot.lane.b32.xlu0 %v1625_v14, %s1273_s18 }
  0xe8   :  { %v1160_v16 = vpop.f32.mrf.mxu0  ;;  %v1226_v17 = vpop.f32.mrf.mxu1 }
  0xea   :  { %v1633_v18 = vpop.f32.mrf.mxu0  ;;  %v1635_v19 = vpop.f32.mrf.mxu1 }
  0xeb   :  { %572 = vrot.lane.b32.xlu0 %v1627_v15, %s1273_s18  ;;  %530 = vrot.lane.b32.xlu1 %v1633_v18, %s1273_s18 }
  0xec   :  { %v1163_v20 = vpop.f32.mrf.mxu0  ;;  %v1229_v21 = vpop.f32.mrf.mxu1 }
  0xee   :  { %v1641_v22 = vpop.f32.mrf.mxu0  ;;  %v1643_v23 = vpop.f32.mrf.mxu1 }
  0xef   :  { %574 = vrot.lane.b32.xlu1 %v1635_v19, %s1273_s18  ;;  %532 = vrot.lane.b32.xlu0 %v1641_v22, %s1273_s18 }
  0xf0   :  { %v1166_v24 = vpop.f32.mrf.mxu0  ;;  %v1232_v25 = vpop.f32.mrf.mxu1 }
  0xf2   :  { %v1649_v26 = vpop.f32.mrf.mxu0  ;;  %v1651_v27 = vpop.f32.mrf.mxu1 }
  0xf3   :  { %576 = vrot.lane.b32.xlu0 %v1643_v23, %s1273_s18  ;;  %534 = vrot.lane.b32.xlu1 %v1649_v26, %s1273_s18 }
  0xf4   :  { %v1169_v28 = vpop.f32.mrf.mxu0  ;;  %v1235_v29 = vpop.f32.mrf.mxu1 }
  0xf6   :  { %v1657_v30 = vpop.f32.mrf.mxu0  ;;  %v1659_v31 = vpop.f32.mrf.mxu1 }
  0xf7   :  { %578 = vrot.lane.b32.xlu1 %v1651_v27, %s1273_s18  ;;  %536 = vrot.lane.b32.xlu0 %v1657_v30, %s1273_s18 }
  0xf8   :  { %v1172_v32 = vpop.f32.mrf.mxu0  ;;  %v1238_v33 = vpop.f32.mrf.mxu1 }
  0xfa   :  { %v1665_v34 = vpop.f32.mrf.mxu0  ;;  %v1667_v35 = vpop.f32.mrf.mxu1 }
  0xfb   :  { %580 = vrot.lane.b32.xlu0 %v1659_v31, %s1273_s18  ;;  %538 = vrot.lane.b32.xlu1 %v1665_v34, %s1273_s18 }
  0xfc   :  { %v1175_v36 = vpop.f32.mrf.mxu0  ;;  %v1241_v37 = vpop.f32.mrf.mxu1 }
  0xfe   :  { %v1673_v38 = vpop.f32.mrf.mxu0  ;;  %v1675_v39 = vpop.f32.mrf.mxu1 }
  0xff   :  { %582 = vrot.lane.b32.xlu1 %v1667_v35, %s1273_s18  ;;  %540 = vrot.lane.b32.xlu0 %v1673_v38, %s1273_s18 }
 0x100   :  { %v1178_v40 = vpop.f32.mrf.mxu0  ;;  %v1244_v41 = vpop.f32.mrf.mxu1 }
 0x102   :  { %v1681_v42 = vpop.f32.mrf.mxu0  ;;  %v1683_v43 = vpop.f32.mrf.mxu1 }
 0x103   :  { %584 = vrot.lane.b32.xlu0 %v1675_v39, %s1273_s18  ;;  %542 = vrot.lane.b32.xlu1 %v1681_v42, %s1273_s18 }
 0x104   :  { %v1181_v44 = vpop.f32.mrf.mxu0  ;;  %v1247_v45 = vpop.f32.mrf.mxu1 }
 0x106   :  { %v1689_v48 = vpop.f32.mrf.mxu0  ;;  %v1691_v49 = vpop.f32.mrf.mxu1 }
 0x107   :  { %586 = vrot.lane.b32.xlu1 %v1683_v43, %s1273_s18  ;;  %544 = vrot.lane.b32.xlu0 %v1689_v48, %s1273_s18 }
 0x108   :  { %v1184_v52 = vpop.f32.mrf.mxu0  ;;  %v1250_v53 = vpop.f32.mrf.mxu1 }
 0x10a   :  { %v1697_v56 = vpop.f32.mrf.mxu0  ;;  %v1699_v57 = vpop.f32.mrf.mxu1 }
 0x10b   :  { %588 = vrot.lane.b32.xlu0 %v1691_v49, %s1273_s18  ;;  %546 = vrot.lane.b32.xlu1 %v1697_v56, %s1273_s18 }
 0x10c   :  { %v1187_v60 = vpop.f32.mrf.mxu0  ;;  %v1253_v61 = vpop.f32.mrf.mxu1 }
 0x10e   :  { %v1705_v0 = vpop.f32.mrf.mxu0  ;;  %v1707_v1 = vpop.f32.mrf.mxu1 }
 0x10f   :  { %590 = vrot.lane.b32.xlu1 %v1699_v57, %s1273_s18  ;;  %548 = vrot.lane.b32.xlu0 %v1705_v0, %s1273_s18 }
 0x110   :  { %v1190_v4 = vpop.f32.mrf.mxu0  ;;  %v1256_v5 = vpop.f32.mrf.mxu1 }
 0x112   :  { %v1713_v8 = vpop.f32.mrf.mxu0  ;;  %v1715_v9 = vpop.f32.mrf.mxu1 }
 0x113   :  { %592 = vrot.lane.b32.xlu0 %v1707_v1, %s1273_s18  ;;  %550 = vrot.lane.b32.xlu1 %v1713_v8, %s1273_s18 }
 0x114   :  { %v1193_v12 = vpop.f32.mrf.mxu0  ;;  %v1259_v13 = vpop.f32.mrf.mxu1 }
 0x116   :  { %v1721_v16 = vpop.f32.mrf.mxu0  ;;  %v1723_v17 = vpop.f32.mrf.mxu1 }
 0x117   :  { %594 = vrot.lane.b32.xlu1 %v1715_v9, %s1273_s18  ;;  %552 = vrot.lane.b32.xlu0 %v1721_v16, %s1273_s18 }
 0x118   :  { %v1196_v20 = vpop.f32.mrf.mxu0  ;;  %v1262_v21 = vpop.f32.mrf.mxu1 }
 0x11a   :  { %v1729_v24 = vpop.f32.mrf.mxu0 }
 0x11b   :  { %596 = vrot.lane.b32.xlu0 %v1723_v17, %s1273_s18  ;;  %554 = vrot.lane.b32.xlu1 %v1729_v24, %s1273_s18 }
 0x11c   :  { %v1199_v25 = vpop.f32.mrf.mxu0 }
 0x139   :  { %v513_v28 = vpop.permute.xlu0 %512 }
 0x13a   :  { %v1736_v29 = vmax.f32 %v1563_v46, %v513_v28 }
 0x13c   :  { %727 = vrot.lane.b32.xlu1 %v1736_v29, %s1274_s0 }
 0x13d   :  { %v559_v32 = vpop.permute.xlu1 %558  ;;  %v557_v33 = vpop.permute.xlu0 %556 }
 0x13e   :  { %v1741_v36 = vmax.f32 %v1565_v47, %v557_v33  ;;  %v1756_v45 = vmax.f32 %v1571_v51, %v559_v32 }
 0x140   :  { %771 = vrot.lane.b32.xlu1 %v1741_v36, %s1274_s0 }
 0x141   :  { %v515_v37 = vpop.permute.xlu0 %514  ;;  %v517_v40 = vpop.permute.xlu1 %516 }
 0x142   :  { %v1746_v41 = vmax.f32 %v1569_v50, %v515_v37  ;;  %v1749_v46 = vmax.f32 %v1577_v54, %v517_v40 }
 0x144   :  { %729 = vrot.lane.b32.xlu0 %v1746_v41, %s1274_s0  ;;  %731 = vrot.lane.b32.xlu1 %v1749_v46, %s1274_s0 }
 0x145   :  { %v561_v44 = vpop.permute.xlu0 %560  ;;  %v519_v47 = vpop.permute.xlu1 %518 }
 0x146   :  { %v1759_v52 = vmax.f32 %v1579_v55, %v561_v44  ;;  %v1766_v53 = vmax.f32 %v1585_v58, %v519_v47 }
 0x148   :  { %773 = vrot.lane.b32.xlu0 %v1756_v45, %s1274_s0  ;;  %775 = vrot.lane.b32.xlu1 %v1759_v52, %s1274_s0 }
 0x149   :  { %v563_v50 = vpop.permute.xlu1 %562  ;;  %v521_v54 = vpop.permute.xlu0 %520 }
 0x14a   :  { %v1769_v60 = vmax.f32 %v1593_v62, %v521_v54  ;;  %v1776_v61 = vmax.f32 %v1587_v59, %v563_v50 }
 0x14c   :  { %733 = vrot.lane.b32.xlu0 %v1766_v53, %s1274_s0  ;;  %735 = vrot.lane.b32.xlu1 %v1769_v60, %s1274_s0 }
 0x14d   :  { %v565_v51 = vpop.permute.xlu0 %564  ;;  %v523_v55 = vpop.permute.xlu1 %522 }
 0x14e   :  { %v1779_v4 = vmax.f32 %v1595_v63, %v565_v51  ;;  %v1786_v5 = vmax.f32 %v1601_v2, %v523_v55 }
 0x150   :  { %777 = vrot.lane.b32.xlu0 %v1776_v61, %s1274_s0  ;;  %779 = vrot.lane.b32.xlu1 %v1779_v4, %s1274_s0 }
 0x151   :  { %v567_v58 = vpop.permute.xlu1 %566  ;;  %v525_v62 = vpop.permute.xlu0 %524 }
 0x152   :  { %v1789_v12 = vmax.f32 %v1609_v6, %v525_v62  ;;  %v1796_v13 = vmax.f32 %v1603_v3, %v567_v58 }
 0x154   :  { %737 = vrot.lane.b32.xlu0 %v1786_v5, %s1274_s0  ;;  %739 = vrot.lane.b32.xlu1 %v1789_v12, %s1274_s0 }
 0x155   :  { %v569_v59 = vpop.permute.xlu0 %568  ;;  %v527_v63 = vpop.permute.xlu1 %526 }
 0x156   :  { %v1799_v20 = vmax.f32 %v1611_v7, %v569_v59  ;;  %v1806_v21 = vmax.f32 %v1617_v10, %v527_v63 }
 0x158   :  { %781 = vrot.lane.b32.xlu0 %v1796_v13, %s1274_s0  ;;  %783 = vrot.lane.b32.xlu1 %v1799_v20, %s1274_s0 }
 0x159   :  { %v571_v2 = vpop.permute.xlu1 %570  ;;  %v529_v6 = vpop.permute.xlu0 %528 }
 0x15a   :  { %v1809_v25 = vmax.f32 %v1625_v14, %v529_v6  ;;  %v1816_v28 = vmax.f32 %v1619_v11, %v571_v2 }
 0x15c   :  { %741 = vrot.lane.b32.xlu0 %v1806_v21, %s1274_s0  ;;  %743 = vrot.lane.b32.xlu1 %v1809_v25, %s1274_s0 }
 0x15d   :  { %v573_v3 = vpop.permute.xlu0 %572  ;;  %v531_v7 = vpop.permute.xlu1 %530 }
 0x15e   :  { %v1819_v32 = vmax.f32 %v1627_v15, %v573_v3  ;;  %v1826_v33 = vmax.f32 %v1633_v18, %v531_v7 }
 0x160   :  { %785 = vrot.lane.b32.xlu0 %v1816_v28, %s1274_s0  ;;  %787 = vrot.lane.b32.xlu1 %v1819_v32, %s1274_s0 }
 0x161   :  { %v575_v10 = vpop.permute.xlu1 %574  ;;  %v533_v14 = vpop.permute.xlu0 %532 }
 0x162   :  { %v1829_v37 = vmax.f32 %v1641_v22, %v533_v14  ;;  %v1836_v40 = vmax.f32 %v1635_v19, %v575_v10 }
 0x164   :  { %745 = vrot.lane.b32.xlu0 %v1826_v33, %s1274_s0  ;;  %747 = vrot.lane.b32.xlu1 %v1829_v37, %s1274_s0 }
 0x165   :  { %v577_v11 = vpop.permute.xlu0 %576  ;;  %v535_v15 = vpop.permute.xlu1 %534 }
 0x166   :  { %v1839_v44 = vmax.f32 %v1643_v23, %v577_v11  ;;  %v1846_v47 = vmax.f32 %v1649_v26, %v535_v15 }
 0x168   :  { %789 = vrot.lane.b32.xlu0 %v1836_v40, %s1274_s0  ;;  %791 = vrot.lane.b32.xlu1 %v1839_v44, %s1274_s0 }
 0x169   :  { %v579_v18 = vpop.permute.xlu1 %578  ;;  %v537_v22 = vpop.permute.xlu0 %536 }
 0x16a   :  { %v1849_v50 = vmax.f32 %v1657_v30, %v537_v22  ;;  %v1856_v54 = vmax.f32 %v1651_v27, %v579_v18 }
 0x16c   :  { %749 = vrot.lane.b32.xlu0 %v1846_v47, %s1274_s0  ;;  %751 = vrot.lane.b32.xlu1 %v1849_v50, %s1274_s0 }
 0x16d   :  { %v581_v19 = vpop.permute.xlu0 %580  ;;  %v539_v23 = vpop.permute.xlu1 %538 }
 0x16e   :  { %v1859_v51 = vmax.f32 %v1659_v31, %v581_v19  ;;  %v1866_v55 = vmax.f32 %v1665_v34, %v539_v23 }
 0x170   :  { %793 = vrot.lane.b32.xlu0 %v1856_v54, %s1274_s0  ;;  %795 = vrot.lane.b32.xlu1 %v1859_v51, %s1274_s0 }
 0x171   :  { %v583_v26 = vpop.permute.xlu1 %582  ;;  %v541_v30 = vpop.permute.xlu0 %540 }
 0x172   :  { %v1869_v58 = vmax.f32 %v1673_v38, %v541_v30  ;;  %v1876_v62 = vmax.f32 %v1667_v35, %v583_v26 }
 0x174   :  { %753 = vrot.lane.b32.xlu0 %v1866_v55, %s1274_s0  ;;  %755 = vrot.lane.b32.xlu1 %v1869_v58, %s1274_s0 }
 0x175   :  { %v585_v27 = vpop.permute.xlu0 %584  ;;  %v543_v31 = vpop.permute.xlu1 %542 }
 0x176   :  { %v1879_v59 = vmax.f32 %v1675_v39, %v585_v27  ;;  %v1886_v63 = vmax.f32 %v1681_v42, %v543_v31 }
 0x178   :  { %797 = vrot.lane.b32.xlu0 %v1876_v62, %s1274_s0  ;;  %799 = vrot.lane.b32.xlu1 %v1879_v59, %s1274_s0 }
 0x179   :  { %v587_v34 = vpop.permute.xlu1 %586  ;;  %v545_v38 = vpop.permute.xlu0 %544 }
 0x17a   :  { %v1889_v2 = vmax.f32 %v1689_v48, %v545_v38  ;;  %v1896_v6 = vmax.f32 %v1683_v43, %v587_v34 }
 0x17c   :  { %757 = vrot.lane.b32.xlu0 %v1886_v63, %s1274_s0  ;;  %759 = vrot.lane.b32.xlu1 %v1889_v2, %s1274_s0 }
 0x17d   :  { %v589_v35 = vpop.permute.xlu0 %588  ;;  %v547_v39 = vpop.permute.xlu1 %546 }
 0x17e   :  { %v1899_v3 = vmax.f32 %v1691_v49, %v589_v35  ;;  %v1906_v7 = vmax.f32 %v1697_v56, %v547_v39 }
 0x180   :  { %801 = vrot.lane.b32.xlu0 %v1896_v6, %s1274_s0  ;;  %803 = vrot.lane.b32.xlu1 %v1899_v3, %s1274_s0 }
 0x181   :  { %v591_v42 = vpop.permute.xlu1 %590  ;;  %v549_v48 = vpop.permute.xlu0 %548 }
 0x182   :  { %v1909_v10 = vmax.f32 %v1705_v0, %v549_v48  ;;  %v1916_v14 = vmax.f32 %v1699_v57, %v591_v42 }
 0x184   :  { %761 = vrot.lane.b32.xlu0 %v1906_v7, %s1274_s0  ;;  %763 = vrot.lane.b32.xlu1 %v1909_v10, %s1274_s0 }
 0x185   :  { %v593_v43 = vpop.permute.xlu0 %592  ;;  %v551_v49 = vpop.permute.xlu1 %550 }
 0x186   :  { %v1919_v11 = vmax.f32 %v1707_v1, %v593_v43  ;;  %v1926_v15 = vmax.f32 %v1713_v8, %v551_v49 }
 0x188   :  { %805 = vrot.lane.b32.xlu0 %v1916_v14, %s1274_s0  ;;  %807 = vrot.lane.b32.xlu1 %v1919_v11, %s1274_s0 }
 0x189   :  { %v595_v56 = vpop.permute.xlu1 %594  ;;  %v553_v0 = vpop.permute.xlu0 %552 }
 0x18a   :  { %v1929_v18 = vmax.f32 %v1721_v16, %v553_v0  ;;  %v1946_v8 = vmax.f32 %v1715_v9, %v595_v56  ;;  %v1953_v16 = vld [vmem:[%s2214_s2] ss:$0 sm:$0xff] }
 0x18c   :  { %765 = vrot.lane.b32.xlu0 %v1926_v15, %s1274_s0  ;;  %767 = vrot.lane.b32.xlu1 %v1929_v18, %s1274_s0 }
 0x18d   :  { %v597_v57 = vpop.permute.xlu0 %596  ;;  %v555_v1 = vpop.permute.xlu1 %554 }
 0x18e   :  { %v1936_v22 = vmax.f32 %v1723_v17, %v597_v57  ;;  %v1939_v19 = vmax.f32 %v1729_v24, %v555_v1 }
 0x190   :  { %811 = vrot.lane.b32.xlu1 %v1936_v22, %s1274_s0  ;;  %769 = vrot.lane.b32.xlu0 %v1939_v19, %s1274_s0 }
 0x194   :  { %809 = vrot.lane.b32.xlu0 %v1946_v8, %s1274_s0 }
 0x1ae   :  { %v728_v17 = vpop.permute.xlu1 %727 }
 0x1af   :  { %v856_v24 = vmax.f32 %v1736_v29, %v728_v17 }
 0x1b1   :  { %v906_v23 = vadd.f32 %v1953_v16, %v856_v24 }
 0x1b2   :  { %v772_v26 = vpop.permute.xlu1 %771 }
 0x1b3   :  { %v949_v30 = vmax.f32 %v906_v23, 0.0  ;;  %v878_v27 = vmax.f32 %v1741_v36, %v772_v26 }
 0x1b5   :  { %993 = vst.msk [vmem:[%s2215_s3] sm:$0xff] %vm992_vm2, %v949_v30  ;;  %v928_v9 = vadd.f32 %v1953_v16, %v878_v27 }
 0x1b6   :  { %v730_v31 = vpop.permute.xlu0 %729  ;;  %v732_v34 = vpop.permute.xlu1 %731 }
 0x1b7   :  { %v971_v38 = vmax.f32 %v928_v9, 0.0  ;;  %v857_v35 = vmax.f32 %v1746_v41, %v730_v31  ;;  %v858_v29 = vmax.f32 %v1749_v46, %v732_v34 }
 0x1b9   :  { %1015 = vst.msk [vmem:[%s2215_s3 + $0xb0] sm:$0xff] %vm992_vm2, %v971_v38  ;;  %v907_v36 = vadd.f32 %v1953_v16, %v857_v35  ;;  %v908_v39 = vadd.f32 %v1953_v16, %v858_v29 }
 0x1ba   :  { %v774_v42 = vpop.permute.xlu0 %773  ;;  %v776_v48 = vpop.permute.xlu1 %775 }
 0x1bb   :  { %v950_v43 = vmax.f32 %v907_v36, 0.0  ;;  %v951_v49 = vmax.f32 %v908_v39, 0.0  ;;  %v879_v56 = vmax.f32 %v1756_v45, %v774_v42  ;;  %v880_v0 = vmax.f32 %v1759_v52, %v776_v48 }
 0x1bd   :  { %994 = vst.msk [vmem:[%s2215_s3 + $0x8] sm:$0xff] %vm992_vm2, %v950_v43  ;;  %995 = vst.msk [vmem:[%s2215_s3 + $0x10] sm:$0xff] %vm992_vm2, %v951_v49  ;;  %v929_v41 = vadd.f32 %v1953_v16, %v879_v56  ;;  %v930_v46 = vadd.f32 %v1953_v16, %v880_v0 }
 0x1be   :  { %v734_v57 = vpop.permute.xlu0 %733  ;;  %v736_v1 = vpop.permute.xlu1 %735 }
 0x1bf   :  { %v972_v17 = vmax.f32 %v929_v41, 0.0  ;;  %v973_v45 = vmax.f32 %v930_v46, 0.0  ;;  %v859_v52 = vmax.f32 %v1766_v53, %v734_v57  ;;  %v860_v24 = vmax.f32 %v1769_v60, %v736_v1 }
 0x1c1   :  { %1016 = vst.msk [vmem:[%s2215_s3 + $0xb8] sm:$0xff] %vm992_vm2, %v972_v17  ;;  %1017 = vst.msk [vmem:[%s2215_s3 + $0xc0] sm:$0xff] %vm992_vm2, %v973_v45  ;;  %v909_v23 = vadd.f32 %v1953_v16, %v859_v52  ;;  %v910_v26 = vadd.f32 %v1953_v16, %v860_v24 }
 0x1c2   :  { %v778_v30 = vpop.permute.xlu0 %777  ;;  %v780_v27 = vpop.permute.xlu1 %779 }
 0x1c3   :  { %v952_v9 = vmax.f32 %v909_v23, 0.0  ;;  %v953_v53 = vmax.f32 %v910_v26, 0.0  ;;  %v881_v60 = vmax.f32 %v1776_v61, %v778_v30  ;;  %v882_v31 = vmax.f32 %v1779_v4, %v780_v27 }
 0x1c5   :  { %996 = vst.msk [vmem:[%s2215_s3 + $0x18] sm:$0xff] %vm992_vm2, %v952_v9  ;;  %997 = vst.msk [vmem:[%s2215_s3 + $0x20] sm:$0xff] %vm992_vm2, %v953_v53  ;;  %v931_v34 = vadd.f32 %v1953_v16, %v881_v60  ;;  %v932_v38 = vadd.f32 %v1953_v16, %v882_v31 }
 0x1c6   :  { %v738_v35 = vpop.permute.xlu0 %737  ;;  %v740_v29 = vpop.permute.xlu1 %739 }
 0x1c7   :  { %v974_v36 = vmax.f32 %v931_v34, 0.0  ;;  %v975_v61 = vmax.f32 %v932_v38, 0.0  ;;  %v861_v4 = vmax.f32 %v1786_v5, %v738_v35  ;;  %v862_v39 = vmax.f32 %v1789_v12, %v740_v29 }
 0x1c9   :  { %1018 = vst.msk [vmem:[%s2215_s3 + $0xc8] sm:$0xff] %vm992_vm2, %v974_v36  ;;  %1019 = vst.msk [vmem:[%s2215_s3 + $0xd0] sm:$0xff] %vm992_vm2, %v975_v61  ;;  %v911_v42 = vadd.f32 %v1953_v16, %v861_v4  ;;  %v912_v48 = vadd.f32 %v1953_v16, %v862_v39 }
 0x1ca   :  { %v782_v43 = vpop.permute.xlu0 %781  ;;  %v784_v49 = vpop.permute.xlu1 %783 }
 0x1cb   :  { %v954_v56 = vmax.f32 %v911_v42, 0.0  ;;  %v955_v5 = vmax.f32 %v912_v48, 0.0  ;;  %v883_v12 = vmax.f32 %v1796_v13, %v782_v43  ;;  %v884_v0 = vmax.f32 %v1799_v20, %v784_v49 }
 0x1cd   :  { %998 = vst.msk [vmem:[%s2215_s3 + $0x28] sm:$0xff] %vm992_vm2, %v954_v56  ;;  %999 = vst.msk [vmem:[%s2215_s3 + $0x30] sm:$0xff] %vm992_vm2, %v955_v5  ;;  %v933_v41 = vadd.f32 %v1953_v16, %v883_v12  ;;  %v934_v46 = vadd.f32 %v1953_v16, %v884_v0 }
 0x1ce   :  { %v742_v57 = vpop.permute.xlu0 %741  ;;  %v744_v1 = vpop.permute.xlu1 %743 }
 0x1cf   :  { %v976_v17 = vmax.f32 %v933_v41, 0.0  ;;  %v977_v13 = vmax.f32 %v934_v46, 0.0  ;;  %v863_v20 = vmax.f32 %v1806_v21, %v742_v57  ;;  %v864_v45 = vmax.f32 %v1809_v25, %v744_v1 }
 0x1d1   :  { %1020 = vst.msk [vmem:[%s2215_s3 + $0xd8] sm:$0xff] %vm992_vm2, %v976_v17  ;;  %1021 = vst.msk [vmem:[%s2215_s3 + $0xe0] sm:$0xff] %vm992_vm2, %v977_v13  ;;  %v913_v52 = vadd.f32 %v1953_v16, %v863_v20  ;;  %v914_v24 = vadd.f32 %v1953_v16, %v864_v45 }
 0x1d2   :  { %v786_v23 = vpop.permute.xlu0 %785  ;;  %v788_v26 = vpop.permute.xlu1 %787 }
 0x1d3   :  { %v956_v30 = vmax.f32 %v913_v52, 0.0  ;;  %v957_v21 = vmax.f32 %v914_v24, 0.0  ;;  %v885_v25 = vmax.f32 %v1816_v28, %v786_v23  ;;  %v886_v27 = vmax.f32 %v1819_v32, %v788_v26 }
 0x1d5   :  { %1000 = vst.msk [vmem:[%s2215_s3 + $0x38] sm:$0xff] %vm992_vm2, %v956_v30  ;;  %1001 = vst.msk [vmem:[%s2215_s3 + $0x40] sm:$0xff] %vm992_vm2, %v957_v21  ;;  %v935_v9 = vadd.f32 %v1953_v16, %v885_v25  ;;  %v936_v53 = vadd.f32 %v1953_v16, %v886_v27 }
 0x1d6   :  { %v746_v60 = vpop.permute.xlu0 %745  ;;  %v748_v31 = vpop.permute.xlu1 %747 }
 0x1d7   :  { %v978_v34 = vmax.f32 %v935_v9, 0.0  ;;  %v979_v28 = vmax.f32 %v936_v53, 0.0  ;;  %v865_v32 = vmax.f32 %v1826_v33, %v746_v60  ;;  %v866_v38 = vmax.f32 %v1829_v37, %v748_v31 }
 0x1d9   :  { %1022 = vst.msk [vmem:[%s2215_s3 + $0xe8] sm:$0xff] %vm992_vm2, %v978_v34  ;;  %1023 = vst.msk [vmem:[%s2215_s3 + $0xf0] sm:$0xff] %vm992_vm2, %v979_v28  ;;  %v915_v35 = vadd.f32 %v1953_v16, %v865_v32  ;;  %v916_v29 = vadd.f32 %v1953_v16, %v866_v38 }
 0x1da   :  { %v790_v36 = vpop.permute.xlu0 %789  ;;  %v792_v61 = vpop.permute.xlu1 %791 }
 0x1db   :  { %v958_v4 = vmax.f32 %v915_v35, 0.0  ;;  %v959_v33 = vmax.f32 %v916_v29, 0.0  ;;  %v887_v37 = vmax.f32 %v1836_v40, %v790_v36  ;;  %v888_v39 = vmax.f32 %v1839_v44, %v792_v61 }
 0x1dd   :  { %1002 = vst.msk [vmem:[%s2215_s3 + $0x48] sm:$0xff] %vm992_vm2, %v958_v4  ;;  %1003 = vst.msk [vmem:[%s2215_s3 + $0x50] sm:$0xff] %vm992_vm2, %v959_v33  ;;  %v937_v42 = vadd.f32 %v1953_v16, %v887_v37  ;;  %v938_v48 = vadd.f32 %v1953_v16, %v888_v39 }
 0x1de   :  { %v750_v43 = vpop.permute.xlu0 %749  ;;  %v752_v49 = vpop.permute.xlu1 %751 }
 0x1df   :  { %v980_v56 = vmax.f32 %v937_v42, 0.0  ;;  %v981_v40 = vmax.f32 %v938_v48, 0.0  ;;  %v867_v44 = vmax.f32 %v1846_v47, %v750_v43  ;;  %v868_v5 = vmax.f32 %v1849_v50, %v752_v49 }
 0x1e1   :  { %1024 = vst.msk [vmem:[%s2215_s3 + $0xf8] sm:$0xff] %vm992_vm2, %v980_v56  ;;  %1025 = vst.msk [vmem:[%s2215_s3 + $0x100] sm:$0xff] %vm992_vm2, %v981_v40  ;;  %v917_v12 = vadd.f32 %v1953_v16, %v867_v44  ;;  %v918_v0 = vadd.f32 %v1953_v16, %v868_v5 }
 0x1e2   :  { %v794_v41 = vpop.permute.xlu0 %793  ;;  %v796_v46 = vpop.permute.xlu1 %795 }
 0x1e3   :  { %v960_v57 = vmax.f32 %v917_v12, 0.0  ;;  %v961_v47 = vmax.f32 %v918_v0, 0.0  ;;  %v889_v50 = vmax.f32 %v1856_v54, %v794_v41  ;;  %v890_v1 = vmax.f32 %v1859_v51, %v796_v46 }
 0x1e5   :  { %1004 = vst.msk [vmem:[%s2215_s3 + $0x58] sm:$0xff] %vm992_vm2, %v960_v57  ;;  %1005 = vst.msk [vmem:[%s2215_s3 + $0x60] sm:$0xff] %vm992_vm2, %v961_v47  ;;  %v939_v17 = vadd.f32 %v1953_v16, %v889_v50  ;;  %v940_v13 = vadd.f32 %v1953_v16, %v890_v1 }
 0x1e6   :  { %v754_v20 = vpop.permute.xlu0 %753  ;;  %v756_v45 = vpop.permute.xlu1 %755 }
 0x1e7   :  { %v982_v52 = vmax.f32 %v939_v17, 0.0  ;;  %v983_v54 = vmax.f32 %v940_v13, 0.0  ;;  %v869_v51 = vmax.f32 %v1866_v55, %v754_v20  ;;  %v870_v24 = vmax.f32 %v1869_v58, %v756_v45 }
 0x1e9   :  { %1026 = vst.msk [vmem:[%s2215_s3 + $0x108] sm:$0xff] %vm992_vm2, %v982_v52  ;;  %1027 = vst.msk [vmem:[%s2215_s3 + $0x110] sm:$0xff] %vm992_vm2, %v983_v54  ;;  %v919_v23 = vadd.f32 %v1953_v16, %v869_v51  ;;  %v920_v26 = vadd.f32 %v1953_v16, %v870_v24 }
 0x1ea   :  { %v798_v30 = vpop.permute.xlu0 %797  ;;  %v800_v21 = vpop.permute.xlu1 %799 }
 0x1eb   :  { %v962_v25 = vmax.f32 %v919_v23, 0.0  ;;  %v963_v55 = vmax.f32 %v920_v26, 0.0  ;;  %v891_v58 = vmax.f32 %v1876_v62, %v798_v30  ;;  %v892_v27 = vmax.f32 %v1879_v59, %v800_v21 }
 0x1ed   :  { %1006 = vst.msk [vmem:[%s2215_s3 + $0x68] sm:$0xff] %vm992_vm2, %v962_v25  ;;  %1007 = vst.msk [vmem:[%s2215_s3 + $0x70] sm:$0xff] %vm992_vm2, %v963_v55  ;;  %v941_v9 = vadd.f32 %v1953_v16, %v891_v58  ;;  %v942_v53 = vadd.f32 %v1953_v16, %v892_v27 }
 0x1ee   :  { %v758_v60 = vpop.permute.xlu0 %757  ;;  %v760_v31 = vpop.permute.xlu1 %759 }
 0x1ef   :  { %v984_v34 = vmax.f32 %v941_v9, 0.0  ;;  %v985_v62 = vmax.f32 %v942_v53, 0.0  ;;  %v871_v59 = vmax.f32 %v1886_v63, %v758_v60  ;;  %v872_v28 = vmax.f32 %v1889_v2, %v760_v31 }
 0x1f1   :  { %1028 = vst.msk [vmem:[%s2215_s3 + $0x118] sm:$0xff] %vm992_vm2, %v984_v34  ;;  %1029 = vst.msk [vmem:[%s2215_s3 + $0x120] sm:$0xff] %vm992_vm2, %v985_v62  ;;  %v921_v32 = vadd.f32 %v1953_v16, %v871_v59  ;;  %v922_v38 = vadd.f32 %v1953_v16, %v872_v28 }
 0x1f2   :  { %v802_v35 = vpop.permute.xlu0 %801  ;;  %v804_v29 = vpop.permute.xlu1 %803 }
 0x1f3   :  { %v964_v36 = vmax.f32 %v921_v32, 0.0  ;;  %v965_v63 = vmax.f32 %v922_v38, 0.0  ;;  %v893_v2 = vmax.f32 %v1896_v6, %v802_v35  ;;  %v894_v61 = vmax.f32 %v1899_v3, %v804_v29 }
 0x1f5   :  { %1008 = vst.msk [vmem:[%s2215_s3 + $0x78] sm:$0xff] %vm992_vm2, %v964_v36  ;;  %1009 = vst.msk [vmem:[%s2215_s3 + $0x80] sm:$0xff] %vm992_vm2, %v965_v63  ;;  %v943_v4 = vadd.f32 %v1953_v16, %v893_v2  ;;  %v944_v33 = vadd.f32 %v1953_v16, %v894_v61 }
 0x1f6   :  { %v762_v37 = vpop.permute.xlu0 %761  ;;  %v764_v39 = vpop.permute.xlu1 %763 }
 0x1f7   :  { %v986_v42 = vmax.f32 %v943_v4, 0.0  ;;  %v987_v6 = vmax.f32 %v944_v33, 0.0  ;;  %v873_v3 = vmax.f32 %v1906_v7, %v762_v37  ;;  %v874_v48 = vmax.f32 %v1909_v10, %v764_v39 }
 0x1f9   :  { %1030 = vst.msk [vmem:[%s2215_s3 + $0x128] sm:$0xff] %vm992_vm2, %v986_v42  ;;  %1031 = vst.msk [vmem:[%s2215_s3 + $0x130] sm:$0xff] %vm992_vm2, %v987_v6  ;;  %v923_v43 = vadd.f32 %v1953_v16, %v873_v3  ;;  %v924_v49 = vadd.f32 %v1953_v16, %v874_v48 }
 0x1fa   :  { %v806_v56 = vpop.permute.xlu0 %805  ;;  %v808_v40 = vpop.permute.xlu1 %807 }
 0x1fb   :  { %v966_v44 = vmax.f32 %v923_v43, 0.0  ;;  %v967_v7 = vmax.f32 %v924_v49, 0.0  ;;  %v895_v10 = vmax.f32 %v1916_v14, %v806_v56  ;;  %v896_v5 = vmax.f32 %v1919_v11, %v808_v40 }
 0x1fd   :  { %1010 = vst.msk [vmem:[%s2215_s3 + $0x88] sm:$0xff] %vm992_vm2, %v966_v44  ;;  %1011 = vst.msk [vmem:[%s2215_s3 + $0x90] sm:$0xff] %vm992_vm2, %v967_v7  ;;  %v945_v12 = vadd.f32 %v1953_v16, %v895_v10  ;;  %v946_v0 = vadd.f32 %v1953_v16, %v896_v5 }
 0x1fe   :  { %v766_v41 = vpop.permute.xlu0 %765  ;;  %v768_v46 = vpop.permute.xlu1 %767 }
 0x1ff   :  { %v988_v57 = vmax.f32 %v945_v12, 0.0  ;;  %v989_v14 = vmax.f32 %v946_v0, 0.0  ;;  %v875_v11 = vmax.f32 %v1926_v15, %v766_v41  ;;  %v876_v47 = vmax.f32 %v1929_v18, %v768_v46 }
 0x201   :  { %1032 = vst.msk [vmem:[%s2215_s3 + $0x138] sm:$0xff] %vm992_vm2, %v988_v57  ;;  %1033 = vst.msk [vmem:[%s2215_s3 + $0x140] sm:$0xff] %vm992_vm2, %v989_v14  ;;  %v925_v50 = vadd.f32 %v1953_v16, %v875_v11  ;;  %v926_v1 = vadd.f32 %v1953_v16, %v876_v47 }
 0x202   :  { %v770_v17 = vpop.permute.xlu0 %769  ;;  %v812_v13 = vpop.permute.xlu1 %811 }
 0x203   :  { %v968_v20 = vmax.f32 %v925_v50, 0.0  ;;  %v969_v15 = vmax.f32 %v926_v1, 0.0  ;;  %v877_v18 = vmax.f32 %v1939_v19, %v770_v17  ;;  %v898_v45 = vmax.f32 %v1936_v22, %v812_v13 }
 0x205   :  { %1012 = vst.msk [vmem:[%s2215_s3 + $0x98] sm:$0xff] %vm992_vm2, %v968_v20  ;;  %1013 = vst.msk [vmem:[%s2215_s3 + $0xa0] sm:$0xff] %vm992_vm2, %v969_v15  ;;  %v927_v52 = vadd.f32 %v1953_v16, %v877_v18  ;;  %v948_v54 = vadd.f32 %v1953_v16, %v898_v45 }
 0x206   :  { %v810_v51 = vpop.permute.xlu0 %809 }
 0x207   :  { %v970_v24 = vmax.f32 %v927_v52, 0.0  ;;  %v991_v19 = vmax.f32 %v948_v54, 0.0  ;;  %v897_v22 = vmax.f32 %v1946_v8, %v810_v51 }
 0x209   :  { %1014 = vst.msk [vmem:[%s2215_s3 + $0xa8] sm:$0xff] %vm992_vm2, %v970_v24  ;;  %v947_v23 = vadd.f32 %v1953_v16, %v897_v22 }
 0x20a   :  { %1036 = vst.msk [vmem:[%s2215_s3 + $0x150] sm:$0x3] %vm1035_vm3, %v991_v19 }
 0x20b   :  { %v990_v26 = vmax.f32 %v947_v23, 0.0 }
 0x20d   :  { %1034 = vst.msk [vmem:[%s2215_s3 + $0x148] sm:$0xff] %vm992_vm2, %v990_v26 }

</bundles_post_ra>
